<compile_context>
chip_gen: v7x
topology: tpu7x:2x2x1
jax: 0.10.0
libtpu: 0.0.40
codegen_flags: <defaults>
</compile_context>

<pallas_src>
import functools

import jax
import jax.numpy as jnp
from jax.experimental import pallas as pl
from jax.experimental.pallas import tpu as pltpu

LANE = 1024           # lane-dense last dim: 8 full 128-lane vregs per f32 row
MAX_TILE_ROWS = 1024  # (1024, 1024) f32 tile = 4 MiB -> ~16 MiB resident w/ double buffering


def _scaling_kernel(x_ref, o_ref, *, inv_scale_sq):
    # Single VPU multiply per vreg; free under the HBM-bandwidth roofline.
    # (For integer inputs PyTorch would promote to float; here we keep x.dtype.)
    o_ref[...] = x_ref[...] * jnp.asarray(inv_scale_sq, dtype=x_ref.dtype)


def _pick_layout(n):
    """Choose (rows, tile_rows, padded_len) for a lane-dense (rows, LANE) view."""
    padded = pl.cdiv(n, LANE) * LANE
    rows = padded // LANE
    # If rows is large but not a multiple of 8, pad further so we can tile with
    # (8,128)-aligned blocks instead of one huge monolithic block.
    if rows % 8 != 0 and rows > 8:
        padded = pl.cdiv(n, 8 * LANE) * 8 * LANE
        rows = padded // LANE
    if rows % 8 == 0:
        tile_rows = min(MAX_TILE_ROWS, rows)
        while rows % tile_rows:
            tile_rows //= 2  # stays a multiple of 8 (>= 8), always divides rows
    else:
        tile_rows = rows     # tiny tensor: single block == full array (always legal)
    return rows, tile_rows, padded


def scaling_layer_forward(x, scaling=1):
    """Pallas equivalent of scaling_layer.forward: x / scaling**2 (static scaling)."""
    inv_scale_sq = 1.0 / float(scaling) ** 2
    orig_shape = x.shape
    n = x.size

    rows, tile_rows, padded = _pick_layout(n)

    flat = x.reshape(-1)
    if padded != n:
        flat = jnp.pad(flat, (0, padded - n))
    x2d = flat.reshape(rows, LANE)

    kernel = functools.partial(_scaling_kernel, inv_scale_sq=inv_scale_sq)
    out2d = pl.pallas_call(
        kernel,
        out_shape=jax.ShapeDtypeStruct((rows, LANE), x.dtype),
        grid=(rows // tile_rows,),
        in_specs=[pl.BlockSpec((tile_rows, LANE), lambda i: (i, 0))],
        out_specs=pl.BlockSpec((tile_rows, LANE), lambda i: (i, 0)),
        compiler_params=pltpu.CompilerParams(
            dimension_semantics=("parallel",),
        ),
    )(x2d)

    out_flat = out2d.reshape(-1)
    if padded != n:
        out_flat = out_flat[:n]
    return out_flat.reshape(orig_shape)


if __name__ == "__main__":
    key = jax.random.PRNGKey(0)

    # Primary case: NCHW input, same convention as the PyTorch module.
    x = jax.random.normal(key, (2, 4, 16, 16), dtype=jnp.float32)
    scaling = 2  # module default is 1; use 2 to exercise the math
    out = scaling_layer_forward(x, scaling=scaling)
    out = jax.block_until_ready(out)
    ref = x / float(scaling) ** 2
    assert out.shape == x.shape and out.dtype == x.dtype
    assert jnp.allclose(out, ref, atol=1e-6, rtol=1e-6)

    # Secondary case: flat size not a multiple of 128 -> exercises the padding path.
    x2 = jax.random.normal(jax.random.PRNGKey(1), (2, 3, 5, 7), dtype=jnp.float32)
    out2 = jax.block_until_ready(scaling_layer_forward(x2, scaling=3))
    ref2 = x2 / 9.0
    assert out2.shape == x2.shape and out2.dtype == x2.dtype
    assert jnp.allclose(out2, ref2, atol=1e-6, rtol=1e-6)

    print("KERNEL_OK")
</pallas_src>

<mosaic_0001>
module attributes {stable_mosaic.version = 11 : i64} {
  func.func @_scaling_kernel(%arg0: i32, %arg1: memref<2x1024xf32, #tpu.memory_space<vmem>>, %arg2: memref<2x1024xf32, #tpu.memory_space<vmem>>) attributes {dimension_semantics = [#tpu.dimension_semantics<parallel>], iteration_bounds = array<i64: 1>, scalar_prefetch = 0 : i64, scratch_operands = 0 : i64, tpu.core_type = #tpu.core_type<tc>, window_params = [{transform_indices = @transform_0, window_bounds = array<i64: 2, 1024>}, {transform_indices = @transform_1, window_bounds = array<i64: 2, 1024>}]} {
    %c0 = arith.constant 0 : index
    %c0_0 = arith.constant 0 : index
    %0 = vector.load %arg1[%c0, %c0_0] : memref<2x1024xf32, #tpu.memory_space<vmem>>, vector<2x1024xf32>
    %cst = arith.constant 2.500000e-01 : f32
    %1 = vector.broadcast %cst : f32 to vector<2x1024xf32>
    %2 = arith.mulf %0, %1 : vector<2x1024xf32>
    %c0_1 = arith.constant 0 : index
    %c0_2 = arith.constant 0 : index
    %3 = vector.load %arg2[%c0_1, %c0_2] : memref<2x1024xf32, #tpu.memory_space<vmem>>, vector<2x1024xf32>
    tpu.vector_store %arg2[%c0_1, %c0_2], %2 {strides = array<i32>} : memref<2x1024xf32, #tpu.memory_space<vmem>>, vector<2x1024xf32>,
    return
  }
  func.func @transform_0(%arg0: i32) -> (i32, i32) {
    %c0_i32 = arith.constant 0 : i32
    %c0_i32_0 = arith.constant 0 : i32
    return %arg0, %c0_i32 : i32, i32
  }
  func.func @transform_1(%arg0: i32) -> (i32, i32) {
    %c0_i32 = arith.constant 0 : i32
    %c0_i32_0 = arith.constant 0 : i32
    return %arg0, %c0_i32 : i32, i32
  }
}

</mosaic_0001>

<bundles_post_ra>
// kernel: tpu_custom_call.1
= control target key start
LH: loop header
LB: loop body
LE: loop exit
PB: predicated region body
PF: predicated region fallthrough
CT: control target
= control target key end

     0   :  { %6 = vsyncpa [#allocation3], 0  ;;  %s128_s0 = inlined_call_operand.hbm [shape: f32[2,1024], index: 0, kind: input, shape index: {}]   ;;  %s129_s1 = inlined_call_operand.hbm [shape: f32[2,1024], index: 1, kind: output, shape index: {}]  }
   0x1   :  { %7 = vsyncpa [#allocation4], 0  ;;  %s92_s6 = smov [#allocation2]   ;;  %s44_s10 = scalar_lea.hbm %s128_s0, 256 }
   0x2   :  { %s14_s7 = sshll.u32 %s92_s6, 4  ;;  %p45_p0 = scmp.ne.s32.totalorder %s128_s0, %s44_s10  ;;  %s15_s7 = int_to_ptr.vmem [resolvable:$true] %s14_s7 }
   0x3   :  { %p48_p1 = scmp.lt.u32.totalorder %s44_s10, %s128_s0 }
   0x5   :  { %p50_p2 = pnand %p48_p1, %p45_p0 }
   0x7   :  { %53 = shalt.err (!%p50_p2)
}
   0x8   :  { %s54_s15 = scalar_lea.vmem %s15_s7, 256  ;;  %p59_p4 = scmp.lt.s32.totalorder %s15_s7, %s15_s7 }
   0x9   :  { %p55_p3 = scmp.ne.s32.totalorder %s15_s7, %s54_s15  ;;  %p60_p5 = scmp.lt.s32.totalorder %s54_s15, %s54_s15 }
   0xb   :  { %p61_p6 = por %p60_p5, %p59_p4 }
   0xd   :  { %p62_p7 = pnand %p61_p6, %p55_p3 }
   0xf   :  { %65 = shalt.err (!%p62_p7)
}
  0x10   :  { %17 = dma.hbm_to_vmem [thread:$0]  %s128_s0, 256, %s15_s7, [#allocation3]  }
  0x11   :  { %88 = dma.done.wait [#allocation3], 256  }
  0x12   :  { %89 = vsyncadd [#allocation3], 4294967040  ;;  %s93_s18 = smov [#allocation5]   ;;  %v21_v0 = vld [vmem:[#allocation2] sm:$0xff]  ;;  %v22_v1 = vld [vmem:[#allocation2 + $0x8] sm:$0xff] }
  0x13   :  { %s33_s19 = sshll.u32 %s93_s18, 4  ;;  %v23_v2 = vmul.f32 0.25, %v21_v0  ;;  %v24_v3 = vmul.f32 0.25, %v22_v1  ;;  %s34_s19 = int_to_ptr.vmem [resolvable:$true] %s33_s19 }
  0x14   :  { %s66_s20 = scalar_lea.vmem %s34_s19, 256  ;;  %p71_p9 = scmp.lt.s32.totalorder %s34_s19, %s34_s19 }
  0x15   :  { %25 = vst [vmem:[#allocation5] sm:$0xff] %v23_v2  ;;  %26 = vst [vmem:[#allocation5 + $0x8] sm:$0xff] %v24_v3  ;;  %p67_p8 = scmp.ne.s32.totalorder %s34_s19, %s66_s20  ;;  %p72_p10 = scmp.lt.s32.totalorder %s66_s20, %s66_s20 }
  0x17   :  { %p73_p11 = por %p72_p10, %p71_p9 }
  0x19   :  { %p74_p12 = pnand %p73_p11, %p67_p8 }
  0x1b   :  { %77 = shalt.err (!%p74_p12)
}
  0x1c   :  { %s78_s22 = scalar_lea.hbm %s129_s1, 256 }
  0x1d   :  { %p79_p13 = scmp.ne.s32.totalorder %s129_s1, %s78_s22  ;;  %p82_p0 = scmp.lt.u32.totalorder %s78_s22, %s129_s1 }
  0x1f   :  { %p84_p1 = pnand %p82_p0, %p79_p13 }
  0x21   :  { %87 = shalt.err (!%p84_p1)
}
  0x22   :  { %36 = dma.vmem_to_hbm [thread:$0]  %s34_s19, 256, %s129_s1, [#allocation4]  }
  0x23   :  { %90 = dma.done.wait [#allocation4], 256  }
  0x24   :  { %91 = vsyncadd [#allocation4], 4294967040 }
  0x25   :  { %40 = vsyncpa [#allocation3], 1 }
  0x26   :  { %41 = vsyncpa [#allocation4], 1 }

</bundles_post_ra>
